<compile_context>
chip_gen: v6e
topology: v6e:2x2x1
jax: 0.10.0
libtpu: 0.0.40
codegen_flags: <defaults>
</compile_context>

<pallas_src>
import functools

import jax
import jax.numpy as jnp
from jax.experimental import pallas as pl
from jax.experimental.pallas import tpu as pltpu


def _round_up(x, m):
    return (x + m - 1) // m * m


# ---------------------------------------------------------------------------
# Fused kernel: grid=(num_layers,), one grid step = one GRU layer.
#   tok_ref  : (B_pad, 1)            int32   (constant block across layers)
#   emb_ref  : (V_pad, E_pad)        bf16    (constant block across layers)
#   h0_ref   : (1, B_pad, H_pad)     f32     layer-l slice of the input hidden
#   wih_ref  : (1, IN_pad, 3*H_pad)  bf16    layer-l input weights (transposed)
#   whh_ref  : (1, H_pad, 3*H_pad)   bf16    layer-l hidden weights (transposed)
#   bih_ref  : (1, 1, 3*H_pad)       f32
#   bhh_ref  : (1, 1, 3*H_pad)       f32
#   hout_ref : (1, B_pad, H_pad)     f32     layer-l slice of the new hidden
#   x_scr    : (B_pad, IN_pad)       f32     running layer input (VMEM carry)
# Gate order is PyTorch's (r, z, n); each gate slab is H_pad (=128k) lanes wide.
# ---------------------------------------------------------------------------
def fused_gru_kernel(tok_ref, emb_ref, h0_ref, wih_ref, whh_ref,
                     bih_ref, bhh_ref, hout_ref, x_scr):
    layer = pl.program_id(0)
    B_pad = tok_ref.shape[0]
    V_pad, E_pad = emb_ref.shape
    H_pad = whh_ref.shape[1]

    # Layer 0: fused embedding lookup as a one-hot matmul on the MXU.
    @pl.when(layer == 0)
    def _():
        x_scr[...] = jnp.zeros_like(x_scr)
        tok = tok_ref[...]                                        # (B_pad, 1)
        vocab_iota = jax.lax.broadcasted_iota(jnp.int32, (B_pad, V_pad), 1)
        onehot = (vocab_iota == tok).astype(jnp.bfloat16)         # (B_pad, V_pad)
        x0 = jnp.dot(onehot, emb_ref[...],
                     preferred_element_type=jnp.float32)          # (B_pad, E_pad)
        x_scr[:, 0:E_pad] = x0

    x = x_scr[...].astype(jnp.bfloat16)                           # (B_pad, IN_pad)
    h = h0_ref[0]                                                 # (B_pad, H_pad) f32

    gi = jnp.dot(x, wih_ref[0], preferred_element_type=jnp.float32) + bih_ref[0]
    gh = jnp.dot(h.astype(jnp.bfloat16), whh_ref[0],
                 preferred_element_type=jnp.float32) + bhh_ref[0]

    # 128-aligned gate slices (free static views, no cross-lane shuffles).
    i_r, i_z, i_n = gi[:, 0:H_pad], gi[:, H_pad:2 * H_pad], gi[:, 2 * H_pad:3 * H_pad]
    h_r, h_z, h_n = gh[:, 0:H_pad], gh[:, H_pad:2 * H_pad], gh[:, 2 * H_pad:3 * H_pad]

    r = jax.nn.sigmoid(i_r + h_r)
    z = jax.nn.sigmoid(i_z + h_z)
    n = jnp.tanh(i_n + r * h_n)
    h_new = (1.0 - z) * n + z * h                                 # f32

    hout_ref[0] = h_new                                           # this layer's output row
    x_scr[:, 0:H_pad] = h_new                                     # input for the next layer


# ---------------------------------------------------------------------------
# EncoderRNN forward (GRU, num_layers, unidirectional, dropout=0.0)
# ---------------------------------------------------------------------------
def encoder_rnn_forward(packed, input_tokens, batch_size, hidden):
    """Mirrors EncoderRNN.forward(input, batch_size, hidden) for one time-step."""
    L, IN_pad, H3_pad = packed["w_ih"].shape
    H_pad = packed["w_hh"].shape[1]
    V_pad, E_pad = packed["emb"].shape
    B = batch_size
    H = hidden.shape[-1]
    B_pad = max(8, _round_up(B, 8))

    # Zero-pad batch rows / hidden lanes (zeros stay zero through every layer).
    tok_pad = jnp.zeros((B_pad, 1), jnp.int32).at[:B, 0].set(input_tokens)
    h_pad = jnp.zeros((L, B_pad, H_pad), jnp.float32).at[:, :B, :H].set(hidden)

    h_out_pad = pl.pallas_call(
        fused_gru_kernel,
        out_shape=jax.ShapeDtypeStruct((L, B_pad, H_pad), jnp.float32),
        grid_spec=pltpu.PrefetchScalarGridSpec(
            num_scalar_prefetch=0,
            grid=(L,),
            in_specs=[
                pl.BlockSpec((B_pad, 1), lambda l: (0, 0)),             # tokens
                pl.BlockSpec((V_pad, E_pad), lambda l: (0, 0)),         # embedding (bf16)
                pl.BlockSpec((1, B_pad, H_pad), lambda l: (l, 0, 0)),   # hidden in
                pl.BlockSpec((1, IN_pad, H3_pad), lambda l: (l, 0, 0)), # w_ih (bf16)
                pl.BlockSpec((1, H_pad, H3_pad), lambda l: (l, 0, 0)),  # w_hh (bf16)
                pl.BlockSpec((1, 1, H3_pad), lambda l: (l, 0, 0)),      # b_ih
                pl.BlockSpec((1, 1, H3_pad), lambda l: (l, 0, 0)),      # b_hh
            ],
            out_specs=pl.BlockSpec((1, B_pad, H_pad), lambda l: (l, 0, 0)),
            scratch_shapes=[pltpu.VMEM((B_pad, IN_pad), jnp.float32)],
        ),
        compiler_params=pltpu.CompilerParams(
            dimension_semantics=("arbitrary",)),                        # layer carry
    )(tok_pad, packed["emb"], h_pad, packed["w_ih"], packed["w_hh"],
      packed["b_ih"], packed["b_hh"])

    hidden_out = h_out_pad[:, :B, :H]                                   # (L, B, H)
    output = hidden_out[L - 1][None, :, :]                              # (1, B, H)
    return output, hidden_out


# ---------------------------------------------------------------------------
# Parameter init (PyTorch-style), packing into padded / stacked bf16 arrays,
# and a pure-JAX reference for correctness checking.
# ---------------------------------------------------------------------------
def init_params(key, input_size, embedding_size, hidden_size, num_layers):
    ks = jax.random.split(key, 1 + 4 * num_layers)
    bound = 1.0 / jnp.sqrt(jnp.float32(hidden_size))
    params = {
        "embedding": jax.random.normal(
            ks[0], (input_size, embedding_size), jnp.float32),
        "layers": [],
    }
    for l in range(num_layers):
        in_dim = embedding_size if l == 0 else hidden_size
        k_ih, k_hh, k_bi, k_bh = ks[1 + 4 * l:1 + 4 * (l + 1)]
        w_ih = jax.random.uniform(k_ih, (3 * hidden_size, in_dim),
                                  jnp.float32, -bound, bound)
        w_hh = jax.random.uniform(k_hh, (3 * hidden_size, hidden_size),
                                  jnp.float32, -bound, bound)
        b_ih = jax.random.uniform(k_bi, (3 * hidden_size,),
                                  jnp.float32, -bound, bound)
        b_hh = jax.random.uniform(k_bh, (3 * hidden_size,),
                                  jnp.float32, -bound, bound)
        params["layers"].append({
            "w_ih_t": jnp.transpose(w_ih),          # (IN, 3H)
            "w_hh_t": jnp.transpose(w_hh),          # (H, 3H)
            "b_ih": b_ih.reshape(1, -1),            # (1, 3H)
            "b_hh": b_hh.reshape(1, -1),            # (1, 3H)
        })
    return params


def pack_params(raw):
    """Stack per-layer weights on a leading axis, pad to lane/sublane-dense shapes."""
    emb = raw["embedding"]
    V, E = emb.shape
    H = raw["layers"][0]["w_hh_t"].shape[0]
    L = len(raw["layers"])
    V_pad = _round_up(V, 128)
    E_pad = _round_up(E, 128)
    H_pad = _round_up(H, 128)
    IN_pad = max(E_pad, H_pad)
    H3_pad = 3 * H_pad

    emb_pad = jnp.zeros((V_pad, E_pad), jnp.float32).at[:V, :E].set(emb)

    w_ih = jnp.zeros((L, IN_pad, H3_pad), jnp.float32)
    w_hh = jnp.zeros((L, H_pad, H3_pad), jnp.float32)
    b_ih = jnp.zeros((L, 1, H3_pad), jnp.float32)
    b_hh = jnp.zeros((L, 1, H3_pad), jnp.float32)
    for l, lp in enumerate(raw["layers"]):
        in_dim = lp["w_ih_t"].shape[0]
        for g in range(3):  # gate order r, z, n; each slab at a 128-aligned offset
            w_ih = w_ih.at[l, :in_dim, g * H_pad:g * H_pad + H].set(
                lp["w_ih_t"][:, g * H:(g + 1) * H])
            w_hh = w_hh.at[l, :H, g * H_pad:g * H_pad + H].set(
                lp["w_hh_t"][:, g * H:(g + 1) * H])
            b_ih = b_ih.at[l, 0, g * H_pad:g * H_pad + H].set(
                lp["b_ih"][0, g * H:(g + 1) * H])
            b_hh = b_hh.at[l, 0, g * H_pad:g * H_pad + H].set(
                lp["b_hh"][0, g * H:(g + 1) * H])

    return {
        "emb": emb_pad.astype(jnp.bfloat16),
        "w_ih": w_ih.astype(jnp.bfloat16),
        "w_hh": w_hh.astype(jnp.bfloat16),
        "b_ih": b_ih,
        "b_hh": b_hh,
    }


def init_hidden(num_layers, batch_size, hidden_size, bi_directional=False):
    L = num_layers * 2 if bi_directional else num_layers
    return jnp.zeros((L, batch_size, hidden_size), jnp.float32)


def gru_reference(raw, tokens, hidden):
    """Pure-JAX GRU reference (bf16-rounded weights, f32 math) for tolerance check."""
    def bf(a):
        return a.astype(jnp.bfloat16).astype(jnp.float32)
    x = jnp.take(bf(raw["embedding"]), tokens, axis=0)           # (B, E)
    hs = []
    for l, lp in enumerate(raw["layers"]):
        h = hidden[l]
        gi = x @ bf(lp["w_ih_t"]) + lp["b_ih"]
        gh = h @ bf(lp["w_hh_t"]) + lp["b_hh"]
        i_r, i_z, i_n = jnp.split(gi, 3, axis=-1)
        h_r, h_z, h_n = jnp.split(gh, 3, axis=-1)
        r = jax.nn.sigmoid(i_r + h_r)
        z = jax.nn.sigmoid(i_z + h_z)
        n = jnp.tanh(i_n + r * h_n)
        h_new = (1.0 - z) * n + z * h
        hs.append(h_new)
        x = h_new
    return x[None], jnp.stack(hs, axis=0)


if __name__ == "__main__":
    # Small, forward-consistent sizes.
    input_size = 50          # vocab
    embedding_size = 32
    hidden_size = 32
    num_layers_encoder = 2
    batch_size = 2
    cell_type = "GRU"        # implemented cell
    bi_directional = False
    drop_out = 0.0

    key = jax.random.PRNGKey(0)
    k_params, k_tokens = jax.random.split(key)

    raw_params = init_params(k_params, input_size, embedding_size,
                             hidden_size, num_layers_encoder)
    packed = pack_params(raw_params)

    input_tokens = jax.random.randint(
        k_tokens, (batch_size,), 0, input_size, dtype=jnp.int32)   # one time-step
    hidden0 = init_hidden(num_layers_encoder, batch_size, hidden_size,
                          bi_directional)

    fwd = jax.jit(functools.partial(encoder_rnn_forward, packed),
                  static_argnums=(1,))
    output, hidden = fwd(input_tokens, batch_size, hidden0)
    jax.block_until_ready((output, hidden))

    assert output.shape == (1, batch_size, hidden_size)
    assert hidden.shape == (num_layers_encoder, batch_size, hidden_size)

    ref_out, ref_hidden = gru_reference(raw_params, input_tokens, hidden0)
    assert jnp.allclose(output, ref_out, atol=2e-2, rtol=0.0)
    assert jnp.allclose(hidden, ref_hidden, atol=2e-2, rtol=0.0)

    print("KERNEL_OK")
</pallas_src>

<mosaic_0001>
module attributes {stable_mosaic.version = 11 : i64} {
  func.func @fused_gru_kernel(%arg0: i32, %arg1: memref<8x1xi32, #tpu.memory_space<vmem>>, %arg2: memref<128x128xbf16, #tpu.memory_space<vmem>>, %arg3: memref<1x8x128xf32, #tpu.memory_space<vmem>>, %arg4: memref<1x128x384xbf16, #tpu.memory_space<vmem>>, %arg5: memref<1x128x384xbf16, #tpu.memory_space<vmem>>, %arg6: memref<1x1x384xf32, #tpu.memory_space<vmem>>, %arg7: memref<1x1x384xf32, #tpu.memory_space<vmem>>, %arg8: memref<1x8x128xf32, #tpu.memory_space<vmem>>, %arg9: memref<8x128xf32, #tpu.memory_space<vmem>>) attributes {dimension_semantics = [#tpu.dimension_semantics<arbitrary>], iteration_bounds = array<i64: 2>, scalar_prefetch = 0 : i64, scratch_operands = 1 : i64, tpu.core_type = #tpu.core_type<tc>, window_params = [{pipeline_mode = #tpu.pipeline_mode<synchronous>, transform_indices = @transform_0, window_bounds = array<i64: 8, 1>}, {pipeline_mode = #tpu.pipeline_mode<synchronous>, transform_indices = @transform_1, window_bounds = array<i64: 128, 128>}, {transform_indices = @transform_2, window_bounds = array<i64: 1, 8, 128>}, {transform_indices = @transform_3, window_bounds = array<i64: 1, 128, 384>}, {transform_indices = @transform_4, window_bounds = array<i64: 1, 128, 384>}, {transform_indices = @transform_5, window_bounds = array<i64: 1, 1, 384>}, {transform_indices = @transform_6, window_bounds = array<i64: 1, 1, 384>}, {transform_indices = @transform_7, window_bounds = array<i64: 1, 8, 128>}]} {
    %c0_i32 = arith.constant 0 : i32
    %0 = arith.cmpi eq, %arg0, %c0_i32 : i32
    %1 = arith.extui %0 : i1 to i32
    %c0_i32_0 = arith.constant 0 : i32
    %2 = arith.cmpi ne, %1, %c0_i32_0 : i32
    scf.if %2 {
      %cst_26 = arith.constant 0.000000e+00 : f32
      %52 = vector.broadcast %cst_26 : f32 to vector<8x128xf32>
      %c0_27 = arith.constant 0 : index
      %c0_28 = arith.constant 0 : index
      %53 = vector.load %arg9[%c0_27, %c0_28] : memref<8x128xf32, #tpu.memory_space<vmem>>, vector<8x128xf32>
      tpu.vector_store %arg9[%c0_27, %c0_28], %52 {strides = array<i32>} : memref<8x128xf32, #tpu.memory_space<vmem>>, vector<8x128xf32>,
      %c0_29 = arith.constant 0 : index
      %c0_30 = arith.constant 0 : index
      %54 = vector.load %arg1[%c0_29, %c0_30] : memref<8x1xi32, #tpu.memory_space<vmem>>, vector<8x1xi32>
      %55 = tpu.iota {dimensions = array<i32: 1>} : vector<8x128xi32>
      %56 = vector.broadcast %54 : vector<8x1xi32> to vector<8x128xi32>
      %57 = arith.cmpi eq, %55, %56 : vector<8x128xi32>
      %58 = arith.extui %57 : vector<8x128xi1> to vector<8x128xi32>
      %59 = arith.sitofp %58 : vector<8x128xi32> to vector<8x128xf32>
      %60 = arith.truncf %59 : vector<8x128xf32> to vector<8x128xbf16>
      %c0_31 = arith.constant 0 : index
      %c0_32 = arith.constant 0 : index
      %61 = vector.load %arg2[%c0_31, %c0_32] : memref<128x128xbf16, #tpu.memory_space<vmem>>, vector<128x128xbf16>
      %cst_33 = arith.constant dense<0.000000e+00> : vector<8x128xf32>
      %62 = tpu.matmul %60, %61, %cst_33 {dimension_numbers = #tpu.dot_dimension_numbers<[1], [0], [0], [1], [0, 0, 1, 1], [], []>} : vector<8x128xbf16>, vector<128x128xbf16>, vector<8x128xf32> -> vector<8x128xf32>
      %c0_34 = arith.constant 0 : index
      %c0_35 = arith.constant 0 : index
      %63 = vector.load %arg9[%c0_34, %c0_35] : memref<8x128xf32, #tpu.memory_space<vmem>>, vector<8x128xf32>
      tpu.vector_store %arg9[%c0_34, %c0_35], %62 {strides = array<i32>} : memref<8x128xf32, #tpu.memory_space<vmem>>, vector<8x128xf32>,
    } else {
    }
    %c0 = arith.constant 0 : index
    %c0_1 = arith.constant 0 : index
    %3 = vector.load %arg9[%c0, %c0_1] : memref<8x128xf32, #tpu.memory_space<vmem>>, vector<8x128xf32>
    %4 = arith.truncf %3 : vector<8x128xf32> to vector<8x128xbf16>
    %c0_2 = arith.constant 0 : index
    %c0_3 = arith.constant 0 : index
    %c0_4 = arith.constant 0 : index
    %5 = vector.load %arg3[%c0_2, %c0_3, %c0_4] : memref<1x8x128xf32, #tpu.memory_space<vmem>>, vector<1x8x128xf32>
    %6 = vector.shape_cast %5 : vector<1x8x128xf32> to vector<8x128xf32>
    %c0_5 = arith.constant 0 : index
    %c0_6 = arith.constant 0 : index
    %c0_7 = arith.constant 0 : index
    %7 = vector.load %arg4[%c0_5, %c0_6, %c0_7] : memref<1x128x384xbf16, #tpu.memory_space<vmem>>, vector<1x128x384xbf16>
    %8 = vector.shape_cast %7 : vector<1x128x384xbf16> to vector<128x384xbf16>
    %cst = arith.constant dense<0.000000e+00> : vector<8x384xf32>
    %9 = tpu.matmul %4, %8, %cst {dimension_numbers = #tpu.dot_dimension_numbers<[1], [0], [0], [1], [0, 0, 1, 1], [], []>} : vector<8x128xbf16>, vector<128x384xbf16>, vector<8x384xf32> -> vector<8x384xf32>
    %c0_8 = arith.constant 0 : index
    %c0_9 = arith.constant 0 : index
    %c0_10 = arith.constant 0 : index
    %10 = vector.load %arg6[%c0_8, %c0_9, %c0_10] : memref<1x1x384xf32, #tpu.memory_space<vmem>>, vector<1x1x384xf32>
    %11 = vector.shape_cast %10 : vector<1x1x384xf32> to vector<1x384xf32>
    %12 = vector.broadcast %11 : vector<1x384xf32> to vector<8x384xf32>
    %13 = arith.addf %9, %12 : vector<8x384xf32>
    %14 = arith.truncf %6 : vector<8x128xf32> to vector<8x128xbf16>
    %c0_11 = arith.constant 0 : index
    %c0_12 = arith.constant 0 : index
    %c0_13 = arith.constant 0 : index
    %15 = vector.load %arg5[%c0_11, %c0_12, %c0_13] : memref<1x128x384xbf16, #tpu.memory_space<vmem>>, vector<1x128x384xbf16>
    %16 = vector.shape_cast %15 : vector<1x128x384xbf16> to vector<128x384xbf16>
    %cst_14 = arith.constant dense<0.000000e+00> : vector<8x384xf32>
    %17 = tpu.matmul %14, %16, %cst_14 {dimension_numbers = #tpu.dot_dimension_numbers<[1], [0], [0], [1], [0, 0, 1, 1], [], []>} : vector<8x128xbf16>, vector<128x384xbf16>, vector<8x384xf32> -> vector<8x384xf32>
    %c0_15 = arith.constant 0 : index
    %c0_16 = arith.constant 0 : index
    %c0_17 = arith.constant 0 : index
    %18 = vector.load %arg7[%c0_15, %c0_16, %c0_17] : memref<1x1x384xf32, #tpu.memory_space<vmem>>, vector<1x1x384xf32>
    %19 = vector.shape_cast %18 : vector<1x1x384xf32> to vector<1x384xf32>
    %20 = vector.broadcast %19 : vector<1x384xf32> to vector<8x384xf32>
    %21 = arith.addf %17, %20 : vector<8x384xf32>
    %22 = vector.extract_strided_slice %13 {offsets = [0, 0], sizes = [8, 128], strides = [1, 1]} : vector<8x384xf32> to vector<8x128xf32>
    %23 = vector.extract_strided_slice %13 {offsets = [0, 128], sizes = [8, 128], strides = [1, 1]} : vector<8x384xf32> to vector<8x128xf32>
    %24 = vector.extract_strided_slice %13 {offsets = [0, 256], sizes = [8, 128], strides = [1, 1]} : vector<8x384xf32> to vector<8x128xf32>
    %25 = vector.extract_strided_slice %21 {offsets = [0, 0], sizes = [8, 128], strides = [1, 1]} : vector<8x384xf32> to vector<8x128xf32>
    %26 = vector.extract_strided_slice %21 {offsets = [0, 128], sizes = [8, 128], strides = [1, 1]} : vector<8x384xf32> to vector<8x128xf32>
    %27 = vector.extract_strided_slice %21 {offsets = [0, 256], sizes = [8, 128], strides = [1, 1]} : vector<8x384xf32> to vector<8x128xf32>
    %28 = arith.addf %22, %25 : vector<8x128xf32>
    %29 = arith.negf %28 : vector<8x128xf32>
    %30 = math.exp %29 : vector<8x128xf32>
    %cst_18 = arith.constant 1.000000e+00 : f32
    %31 = vector.broadcast %cst_18 : f32 to vector<8x128xf32>
    %32 = arith.addf %31, %30 : vector<8x128xf32>
    %33 = arith.divf %31, %32 : vector<8x128xf32>
    %34 = arith.addf %23, %26 : vector<8x128xf32>
    %35 = arith.negf %34 : vector<8x128xf32>
    %36 = math.exp %35 : vector<8x128xf32>
    %cst_19 = arith.constant 1.000000e+00 : f32
    %37 = vector.broadcast %cst_19 : f32 to vector<8x128xf32>
    %38 = arith.addf %37, %36 : vector<8x128xf32>
    %39 = arith.divf %37, %38 : vector<8x128xf32>
    %40 = arith.mulf %33, %27 : vector<8x128xf32>
    %41 = arith.addf %24, %40 : vector<8x128xf32>
    %42 = math.tanh %41 : vector<8x128xf32>
    %cst_20 = arith.constant 1.000000e+00 : f32
    %43 = vector.broadcast %cst_20 : f32 to vector<8x128xf32>
    %44 = arith.subf %43, %39 : vector<8x128xf32>
    %45 = arith.mulf %44, %42 : vector<8x128xf32>
    %46 = arith.mulf %39, %6 : vector<8x128xf32>
    %47 = arith.addf %45, %46 : vector<8x128xf32>
    %c0_21 = arith.constant 0 : index
    %c0_22 = arith.constant 0 : index
    %c0_23 = arith.constant 0 : index
    %48 = vector.load %arg8[%c0_21, %c0_22, %c0_23] : memref<1x8x128xf32, #tpu.memory_space<vmem>>, vector<1x8x128xf32>
    %49 = vector.shape_cast %48 : vector<1x8x128xf32> to vector<8x128xf32>
    %50 = vector.shape_cast %47 : vector<8x128xf32> to vector<1x8x128xf32>
    tpu.vector_store %arg8[%c0_21, %c0_22, %c0_23], %50 {strides = array<i32>} : memref<1x8x128xf32, #tpu.memory_space<vmem>>, vector<1x8x128xf32>,
    %c0_24 = arith.constant 0 : index
    %c0_25 = arith.constant 0 : index
    %51 = vector.load %arg9[%c0_24, %c0_25] : memref<8x128xf32, #tpu.memory_space<vmem>>, vector<8x128xf32>
    tpu.vector_store %arg9[%c0_24, %c0_25], %47 {strides = array<i32>} : memref<8x128xf32, #tpu.memory_space<vmem>>, vector<8x128xf32>,
    return
  }
  func.func @transform_0(%arg0: i32) -> (i32, i32) {
    %c0_i32 = arith.constant 0 : i32
    %c0_i32_0 = arith.constant 0 : i32
    %c0_i32_1 = arith.constant 0 : i32
    return %c0_i32, %c0_i32_0 : i32, i32
  }
  func.func @transform_1(%arg0: i32) -> (i32, i32) {
    %c0_i32 = arith.constant 0 : i32
    %c0_i32_0 = arith.constant 0 : i32
    %c0_i32_1 = arith.constant 0 : i32
    return %c0_i32, %c0_i32_0 : i32, i32
  }
  func.func @transform_2(%arg0: i32) -> (i32, i32, i32) {
    %c0_i32 = arith.constant 0 : i32
    %c0_i32_0 = arith.constant 0 : i32
    %c0_i32_1 = arith.constant 0 : i32
    return %arg0, %c0_i32, %c0_i32_0 : i32, i32, i32
  }
  func.func @transform_3(%arg0: i32) -> (i32, i32, i32) {
    %c0_i32 = arith.constant 0 : i32
    %c0_i32_0 = arith.constant 0 : i32
    %c0_i32_1 = arith.constant 0 : i32
    return %arg0, %c0_i32, %c0_i32_0 : i32, i32, i32
  }
  func.func @transform_4(%arg0: i32) -> (i32, i32, i32) {
    %c0_i32 = arith.constant 0 : i32
    %c0_i32_0 = arith.constant 0 : i32
    %c0_i32_1 = arith.constant 0 : i32
    return %arg0, %c0_i32, %c0_i32_0 : i32, i32, i32
  }
  func.func @transform_5(%arg0: i32) -> (i32, i32, i32) {
    %c0_i32 = arith.constant 0 : i32
    %c0_i32_0 = arith.constant 0 : i32
    %c0_i32_1 = arith.constant 0 : i32
    return %arg0, %c0_i32, %c0_i32_0 : i32, i32, i32
  }
  func.func @transform_6(%arg0: i32) -> (i32, i32, i32) {
    %c0_i32 = arith.constant 0 : i32
    %c0_i32_0 = arith.constant 0 : i32
    %c0_i32_1 = arith.constant 0 : i32
    return %arg0, %c0_i32, %c0_i32_0 : i32, i32, i32
  }
  func.func @transform_7(%arg0: i32) -> (i32, i32, i32) {
    %c0_i32 = arith.constant 0 : i32
    %c0_i32_0 = arith.constant 0 : i32
    %c0_i32_1 = arith.constant 0 : i32
    return %arg0, %c0_i32, %c0_i32_0 : i32, i32, i32
  }
}

</mosaic_0001>

<bundles_post_ra>
// kernel: encoder_rnn_forward.1
= control target key start
LH: loop header
LB: loop body
LE: loop exit
PB: predicated region body
PF: predicated region fallthrough
CT: control target
= control target key end

     0   :  { %12 = vsyncpa [#allocation4], 0  ;;  %s1974_s0 = inlined_call_operand.vmem [shape: s32[8,1], index: 0, kind: input, shape index: {}]   ;;  %s1975_s1 = inlined_call_operand.hbm [shape: bf16[128,128], index: 1, kind: input, shape index: {}]   ;;  %s1976_s2 = inlined_call_operand.vmem [shape: f32[2,8,128], index: 2, kind: input, shape index: {}]   ;;  %s1977_s3 = inlined_call_operand.hbm [shape: bf16[2,128,384], index: 3, kind: input, shape index: {}]   ;;  %s1978_s4 = inlined_call_operand.hbm [shape: bf16[2,128,384], index: 4, kind: input, shape index: {}]   ;;  %s1979_s5 = inlined_call_operand.vmem [shape: f32[2,1,384], index: 5, kind: input, shape index: {}]   ;;  %s1980_s6 = inlined_call_operand.vmem [shape: f32[2,1,384], index: 6, kind: input, shape index: {}]   ;;  %s1981_s7 = inlined_call_operand.vmem [shape: f32[2,8,128], index: 7, kind: output, shape index: {}]  }
   0x1   :  { %13 = vsyncpa [#allocation6], 0 }
   0x2   :  { %15 = vsyncpa [#allocation6 + $0x1], 0  ;;  %s1689_s24 = smov 0   ;;  %s1691_s25 = smov 0  }
   0x3   :  { %s1693_s26 = smov 0   ;;  %s1695_s27 = smov 0  }
   0x4 LB: > { %s1710_s28 = sadd.s32 1, %s1633_s27   ;;  %s96_s29 = sadd.s32 1, %s1629_s26  ;;  %s1633_s27 = sphi %s1695_s27, %s1999_s27   ;;  %s1629_s26 = sphi %s1693_s26, %s1998_s26   ;;  %s1625_s25 = sphi %s1691_s25, %s1997_s25   ;;  %s1621_s24 = sphi %s1689_s24, %s1996_s24  }
   0x5   : > { %s93_s30 = ssub.s32 %s1633_s27, %s1710_s28  ;;  %p103_p0 = scmp.ne.s32.totalorder %s1629_s26, %s1625_s25 }
   0x6   : > { %p94_p1 = scmp.eq.s32.totalorder %s93_s30, 0  ;;  %p104_p2 = scmp.eq.s32.totalorder %s1633_s27, 0 }
   0x7   : > { %p1384_p3 = scmp.lt.s32.totalorder %s1633_s27, 2  ;;  %s260_s9 = sand.u32 1, %s1633_s27  }
   0x8   : > { %s1720_s8 = scalar_select %p94_p1, %s1629_s26, %s96_s29  }
   0x9   : > { %p105_p4 = por %p104_p2, %p103_p0  ;;  %s262_s10 = sand.u32 1, %s1629_s26  }
   0xa   : > { %s1724_s11 = smul.u32 192, %s262_s10  ;;  %s1741_s19 = scalar_lea.sflag [#allocation6], %s260_s9 }
   0xb   : > { %p1726_p5 = pnand %p1384_p3, %p105_p4  ;;  %s1359_s13 = smul.u32 3072, %s1633_s27 }
   0xc   : > { %s264_s17 = scalar_lea.vmem [#allocation5], %s1724_s11  ;;  %s1518_s23 = scalar_lea.hbm %s1977_s3, 6144 }
   0xd   : > { %s1736_s16 = scalar_lea.hbm %s1977_s3, %s1359_s13  ;;  %s271_s18 = sshll.u32 %s264_s17, 4  ;;  %s1739_s18 = int_to_ptr.vmem [resolvable:$true] %s271_s18 }
   0xe   : > { %s1513_s20 = scalar_lea.hbm %s1736_s16, 3072  ;;  %p1515_p7 = pneg %p1726_p5 }
   0xf   : > { %p1514_p6 = scmp.ne.s32.totalorder %s1736_s16, %s1513_s20  ;;  %p1519_p10 = scmp.lt.s32.totalorder %s1736_s16, %s1977_s3 }
  0x10   : > { %p1520_p11 = scmp.lt.s32.totalorder %s1518_s23, %s1513_s20 }
  0x11   : > { %p1516_p8 = pnand %p1515_p7, %p1514_p6 }
  0x12   : > { %p1521_p12 = por %p1520_p11, %p1519_p10 }
  0x13   : > { %p1517_p9 = pneg %p1516_p8 }
  0x15   : > { %p1522_p13 = pnand %p1521_p12, %p1517_p9 }
  0x17   : > { %1525 = shalt.err (!%p1522_p13)
}
  0x18   : > { %s1526_s9 = scalar_lea.vmem %s1739_s18, 3072  ;;  %s1635_s10 = smov [#allocation5]  }
  0x19   : > { %p1527_p0 = scmp.ne.s32.totalorder %s1739_s18, %s1526_s9  ;;  %s1531_s14 = sshll.u32 %s1635_s10, 4  ;;  %s1532_s14 = int_to_ptr.vmem [resolvable:$false] %s1531_s14 }
  0x1a   : > { %s1533_s15 = scalar_lea.vmem %s1532_s14, 6144  ;;  %p1534_p3 = scmp.lt.s32.totalorder %s1739_s18, %s1532_s14 }
  0x1b   : > { %p1529_p1 = pnand %p1527_p0, %p1515_p7  ;;  %p1535_p4 = scmp.lt.s32.totalorder %s1533_s15, %s1526_s9 }
  0x1d   : > { %p1530_p2 = pneg %p1529_p1  ;;  %p1536_p6 = por %p1535_p4, %p1534_p3 }
  0x1f   : > { %p1537_p8 = pnand %p1536_p6, %p1530_p2 }
  0x21   : > { %1540 = shalt.err (!%p1537_p8)
}
  0x22   : > { %s1982_s17 = smov 192   ;;  %s1983_s20 = smov 12  }
  0x23   : > { %1379 = dma.hbm_to_vmem [thread:$0]  (!%p1726_p5), %s1736_s16, 3072, %s1739_s18, %s1741_s19, %s1982_s17, %s1982_s17, %s1983_s20  }
  0x24   : > { %s1772_s21 = sadd.s32 4294967295, %s1633_s27   ;;  %p109_p10 = scmp.ne.s32.totalorder %s1625_s25, %s1621_s24 }
  0x25   : > { %p1984_p9 = scmp.eq.s32.totalorder %s1772_s21, 0  ;;  %p1198_p11 = scmp.ge.s32.totalorder %s1633_s27, 1 }
  0x26   : > { %p224_p12 = scmp.lt.s32.totalorder %s1633_s27, 3  ;;  %s1638_s16 = smov [#allocation3]  }
  0x27   : > { %p1782_p0 = por %p1984_p9, %p109_p10  ;;  %s239_s18 = sshll.u32 %s1638_s16, 4  ;;  %s240_s18 = int_to_ptr.vmem [resolvable:$true] %s239_s18 }
  0x28   : > { %p1786_p1 = pnand %p1198_p11, %p224_p12  ;;  %s285_s29 = scalar_lea.vmem [#allocation7], %s1724_s11 }
  0x29   : > { %s1987_s22 = scalar_select %p1782_p0, 1, 0 }
  0x2a   : > { %p1372_p2 = pneg %p1786_p1  ;;  %s292_s30 = sshll.u32 %s285_s29, 4  ;;  %s1806_s30 = int_to_ptr.vmem [resolvable:$true] %s292_s30 }
  0x2b   : > { %s1804_s14 = scalar_lea.hbm %s1978_s4, %s1359_s13  ;;  %s1552_s15 = scalar_lea.vmem %s240_s18, 1024 }
  0x2c   : > { %p1794_p3 = pnand %p1372_p2, %p1984_p9  ;;  %p1553_p6 = scmp.ne.s32.totalorder %s240_s18, %s1552_s15 }
  0x2d   : > { %p1560_p11 = scmp.lt.s32.totalorder %s240_s18, %s240_s18  ;;  %p1561_p12 = scmp.lt.s32.totalorder %s1552_s15, %s1552_s15 }
  0x2e   : > { %p1543_p4 = pneg %p1794_p3 }
  0x2f   : > { %p1562_p2 = por %p1561_p12, %p1560_p11 }
  0x30   : > { %p1555_p8 = pnand %p1553_p6, %p1543_p4 }
  0x32   : > { %p1556_p10 = pneg %p1555_p8 }
  0x34   : > { %p1563_p13 = pnand %p1562_p2, %p1556_p10 }
  0x36   : > { %1566 = shalt.err (!%p1563_p13)
}
  0x37   : > { %s1639_s11 = smov 64   ;;  %s1640_s27 = smov 4  }
  0x38   : > { %1375 = dma.hbm_to_vmem [thread:$0]  (!%p1794_p3), %s1975_s1, 1024, %s240_s18, [#allocation4], %s1639_s11, %s1639_s11, %s1640_s27  }
  0x39   : > { %s1567_s29 = scalar_lea.hbm %s1804_s14, 3072  ;;  %s1572_s15 = scalar_lea.hbm %s1978_s4, 6144 }
  0x3a   : > { %p1568_p4 = scmp.ne.s32.totalorder %s1804_s14, %s1567_s29  ;;  %p1573_p13 = scmp.lt.s32.totalorder %s1804_s14, %s1978_s4 }
  0x3b   : > { %p1574_p10 = scmp.lt.s32.totalorder %s1572_s15, %s1567_s29 }
  0x3c   : > { %p1570_p6 = pnand %p1568_p4, %p1515_p7 }
  0x3d   : > { %p1575_p11 = por %p1574_p10, %p1573_p13 }
  0x3e   : > { %p1571_p8 = pneg %p1570_p6 }
  0x40   : > { %p1576_p12 = pnand %p1575_p11, %p1571_p8 }
  0x42   : > { %1579 = shalt.err (!%p1576_p12)
}
  0x43   : > { %s1580_s18 = scalar_lea.vmem %s1806_s30, 3072  ;;  %s1641_s24 = smov [#allocation7]  }
  0x44   : > { %p1581_p3 = scmp.ne.s32.totalorder %s1806_s30, %s1580_s18  ;;  %s1585_s11 = sshll.u32 %s1641_s24, 4  ;;  %s1586_s11 = int_to_ptr.vmem [resolvable:$false] %s1585_s11 }
  0x45   : > { %s1587_s27 = scalar_lea.vmem %s1586_s11, 6144  ;;  %p1588_p6 = scmp.lt.s32.totalorder %s1806_s30, %s1586_s11 }
  0x46   : > { %p1583_p2 = pnand %p1581_p3, %p1515_p7  ;;  %p1589_p9 = scmp.lt.s32.totalorder %s1587_s27, %s1580_s18 }
  0x48   : > { %p1584_p4 = pneg %p1583_p2  ;;  %p1590_p0 = por %p1589_p9, %p1588_p6 }
  0x4a   : > { %p1591_p13 = pnand %p1590_p0, %p1584_p4 }
  0x4c   : > { %1594 = shalt.err (!%p1591_p13)
}
  0x4d   : > { %s1990_s17 = smov 12   ;;  %s1991_s20 = smov 192  }
  0x4e   : > { %1382 = dma.hbm_to_vmem [thread:$0]  (!%p1726_p5), %s1804_s14, 3072, %s1806_s30, %s1741_s19, %s1991_s20, %s1991_s20, %s1990_s17  }
  0x4f   : > { %318 = sbr.rel (%p1786_p1) target bundleno = 743 (0x2e7), region = 48  ;;  %p1992_p7 = scmp.eq.s32.totalorder (!%p1786_p1), %s1772_s21, 0 }
  0x54   : > { %1612 = dma.done.wait (%p1992_p7), [#allocation4], 1024   ;;  %p1993_p8 = pmov %p1992_p7 }
  0x55   : > { %s324_s12 = sand.u32 1, %s1772_s21   ;;  %s326_s13 = sand.u32 1, %s1625_s25  }
  0x56   : > { %1614 = vsyncadd (%p1993_p8), [#allocation4], 4294966272  ;;  %s1362_s16 = smul.u32 192, %s326_s13  ;;  %s325_s29 = scalar_lea.sflag [#allocation6], %s324_s12 }
  0x57   : > { %p1994_p9 = scmp.ne.s32.totalorder %s1987_s22, 0 }
  0x58   : > { %s1849_s9 = scalar_lea.vmem [#allocation5], %s1362_s16 }
  0x59   : > { %1616 = dma.done.wait (%p1994_p9), %s325_s29, 6144  }
  0x5a   : > { %1618 = vsyncadd (%p1994_p9), %s325_s29, 4294961152  ;;  %p384_p5 = scmp.lt.s32.totalorder %s1772_s21, 1  ;;  %s1877_s29 = scalar_lea.vmem [#allocation7], %s1362_s16 }
  0x5b   : > { %p1995_p0 = scmp.ne.s32.totalorder %s1772_s21, 0 }
  0x5c   : > { %s385_s19 = scalar_select %p384_p5, %s1772_s21, 1 }
  0x5d   : > { %404 = sbr.rel (%p1995_p0) target bundleno = 425 (0x1a9), region = 64 }
  0x5e   : > { %s1205_s23 = sshll.u32 %s385_s19, 3  ;;  %s1363_s30 = smul.u32 3, %s385_s19 }
  0x5f   : > { %s1860_s15 = scalar_lea.vmem %s1976_s2, %s1205_s23  ;;  %s1865_s11 = scalar_lea.vmem %s1981_s7, %s1205_s23 }
  0x60   : > { %s1870_s22 = scalar_lea.vmem %s1979_s5, %s1363_s30  ;;  %s1875_s13 = scalar_lea.vmem %s1980_s6, %s1363_s30 }
  0x62   : > { %v406_v0 = vld [vmem:[%s1974_s0] sm:$0xff]  ;;  %v1642_v2 = vmov 0   ;;  %v1643_v3 = vmov 0.0   ;;  %v1432_v4 = vld [vmem:[#allocation3 + $0x30] sm:$0xff]   ;;  %vm1644_vm0 = vmmov 0   ;;  %v1433_v5 = vld [vmem:[#allocation3 + $0x28] sm:$0xff]   ;;  %v407_v11 = vlaneseq }
  0x63   : > { %v1431_v1 = vld [vmem:[#allocation3 + $0x38] sm:$0xff]   ;;  %1430 = vset.pattern.permute.xlu0 %v1642_v2  ;;  %1298 = vmatprep.subr.bf16.mxu0 %v1643_v3  ;;  %v1434_v6 = vld [vmem:[#allocation3 + $0x20] sm:$0xff]   ;;  %v1436_v8 = vld [vmem:[#allocation3 + $0x10] sm:$0xff]   ;;  %v1645_v14 = vmov 1.0|1.0  }
  0x64   : > { %410 = vperm.xlu0 %1430, %v406_v0   ;;  %1299 = vmatpush3.bf16.msra.mxu0 %v1431_v1  ;;  %v1435_v7 = vld [vmem:[#allocation3 + $0x18] sm:$0xff]   ;;  %v1437_v9 = vld [vmem:[#allocation3 + $0x8] sm:$0xff]   ;;  %v1438_v10 = vld [vmem:[#allocation3] sm:$0xff]   ;;  %v408_v12 = vand.u32 127, %v407_v11 }
  0x65   : > { %1300 = vmatprep.subr.bf16.mxu0 %v1643_v3  ;;  %1314 = vmatprep.mubr.msk.bf16.mxu0 %vm1644_vm0, %v1643_v3 }
  0x68   : > { %1301 = vmatpush3.bf16.msra.mxu0 %v1432_v4 }
  0x69   : > { %1302 = vmatprep.subr.bf16.mxu0 %v1643_v3 }
  0x6c   : > { %1303 = vmatpush3.bf16.msra.mxu0 %v1433_v5 }
  0x6d   : > { %1304 = vmatprep.subr.bf16.mxu0 %v1643_v3 }
  0x70   : > { %1305 = vmatpush3.bf16.msra.mxu0 %v1434_v6 }
  0x71   : > { %1306 = vmatprep.subr.bf16.mxu0 %v1643_v3 }
  0x74   : > { %1307 = vmatpush3.bf16.msra.mxu0 %v1435_v7 }
  0x75   : > { %1308 = vmatprep.subr.bf16.mxu0 %v1643_v3 }
  0x78   : > { %1309 = vmatpush3.bf16.msra.mxu0 %v1436_v8 }
  0x79   : > { %1310 = vmatprep.subr.bf16.mxu0 %v1643_v3 }
  0x7c   : > { %1311 = vmatpush3.bf16.msra.mxu0 %v1437_v9 }
  0x7d   : > { %1312 = vmatprep.subr.bf16.mxu0 %v1643_v3 }
  0x80   : > { %1313 = vmatpush3.bf16.msra.mxu0 %v1438_v10 }
  0xdf   : > { %v411_v13 = vpop.permute.xlu0 %410 }
  0xe0   : > { %vm412_vm1 = vcmp.eq.s32.totalorder %v408_v12, %v411_v13 }
  0xe1   : > { %vm1217_vm2 = vmpackc.low %vm412_vm1, %vm412_vm1 }
  0xe2   : > { %1315 = vmatmul.mubr.msk.bf16.vlgmr.msra.gmra.mxu0 %vm1217_vm2, %v1645_v14 }
 0x1a2   : > { %v514_v15 = vpop.f32.mrf.mxu0 }
 0x1a3   : > { %520 = vst [vmem:[#allocation2] sm:$0xff] %v514_v15 }
 0x1a4   : > { %v1316_v16 = vpop.f32.mrf.mxu0 }
 0x1a6   : > { %v517_v17 = vpop.f32.mrf.mxu0 }
 0x1a8   : > { %v1317_v18 = vpop.f32.mrf.mxu0 }
 0x1a9 PF: > { %v1439_v19 = vld [vmem:[%s1849_s9 + $0xac] ss:$12 sps:$4 sm:$0xff]   ;;  %v1441_v20 = vld [vmem:[%s1849_s9 + $0xa8] ss:$12 sps:$4 sm:$0xff]   ;;  %v1646_v21 = vmov 0.0   ;;  %v1647_v22 = vmov 0   ;;  %v558_v17 = vlaneseq }
 0x1aa   : > { %1318 = vmatprep.subr.bf16.mxu1 %v1646_v21  ;;  %733 = vmatprep.mubr.bf16.mxu0 %v1647_v22  ;;  %v1442_v23 = vld [vmem:[%s1849_s9 + $0x94] ss:$12 sps:$4 sm:$0xff]   ;;  %vm1648_vm3 = vmmov 0   ;;  %v1444_v24 = vld [vmem:[%s1849_s9 + $0x90] ss:$12 sps:$4 sm:$0xff]  }
 0x1ab   : > { %701 = vmatprep.subr.bf16.mxu0 %v1439_v19  ;;  %1334 = vmatprep.mubr.msk.bf16.mxu1 %vm1648_vm3, %v1646_v21  ;;  %v1445_v25 = vld [vmem:[%s1849_s9 + $0x7c] ss:$12 sps:$4 sm:$0xff]   ;;  %v1447_v26 = vld [vmem:[%s1849_s9 + $0x78] ss:$12 sps:$4 sm:$0xff]   ;;  %v1450_v28 = vld [vmem:[%s1849_s9 + $0x60] ss:$12 sps:$4 sm:$0xff]  }
 0x1ac   : > { %702 = vmatpush1.bf16.msra.mxu0 %v1441_v20  ;;  %v1448_v27 = vld [vmem:[%s1849_s9 + $0x64] ss:$12 sps:$4 sm:$0xff]   ;;  %v1451_v30 = vld [vmem:[%s1849_s9 + $0x4c] ss:$12 sps:$4 sm:$0xff]   ;;  %v1453_v32 = vld [vmem:[%s1849_s9 + $0x48] ss:$12 sps:$4 sm:$0xff]  }
 0x1ad   : > { %703 = vmatprep.subr.bf16.mxu0 %v1442_v23  ;;  %v1463_v29 = vld [vmem:[%s1849_s9 + $0xb0] ss:$12 sps:$4 sm:$0xff]   ;;  %v1467_v31 = vld [vmem:[%s1849_s9 + $0x98] ss:$12 sps:$4 sm:$0xff]   ;;  %v1454_v33 = vld [vmem:[%s1849_s9 + $0x34] ss:$12 sps:$4 sm:$0xff]  }
 0x1ae   : > { %1319 = vmatpush3.bf16.msra.mxu1 %v1463_v29  ;;  %v1471_v34 = vld [vmem:[%s1849_s9 + $0x80] ss:$12 sps:$4 sm:$0xff]   ;;  %v1456_v35 = vld [vmem:[%s1849_s9 + $0x30] ss:$12 sps:$4 sm:$0xff]   ;;  %v1475_v37 = vld [vmem:[%s1849_s9 + $0x68] ss:$12 sps:$4 sm:$0xff]  }
 0x1af   : > { %1320 = vmatprep.subr.bf16.mxu1 %v1646_v21  ;;  %v1457_v36 = vld [vmem:[%s1849_s9 + $0x1c] ss:$12 sps:$4 sm:$0xff]   ;;  %v1459_v38 = vld [vmem:[%s1849_s9 + $0x18] ss:$12 sps:$4 sm:$0xff]   ;;  %v1462_v41 = vld [vmem:[%s1849_s9] ss:$12 sps:$4 sm:$0xff]  }
 0x1b0   : > { %704 = vmatpush1.bf16.msra.mxu0 %v1444_v24  ;;  %v1460_v39 = vld [vmem:[%s1849_s9 + $0x4] ss:$12 sps:$4 sm:$0xff]   ;;  %v521_v42 = vld [vmem:[#allocation2] sm:$0xff]  ;;  %v1464_v46 = vld [vmem:[%s1877_s29 + $0xa8] ss:$12 sps:$4 sm:$0xff]   ;;  %v559_v18 = vshrl.u32 %v558_v17, 7 }
 0x1b1   : > { %705 = vmatprep.subr.bf16.mxu0 %v1445_v25  ;;  %v1479_v40 = vld [vmem:[%s1849_s9 + $0x50] ss:$12 sps:$4 sm:$0xff]   ;;  %v1466_v43 = vld [vmem:[%s1877_s29 + $0xac] ss:$12 sps:$4 sm:$0xff]   ;;  %v522_v45 = vpack.c.bf16 %v521_v42, %v521_v42  ;;  %v1470_v47 = vld [vmem:[%s1877_s29 + $0x94] ss:$12 sps:$4 sm:$0xff]  }
 0x1b2   : > { %1321 = vmatpush3.bf16.msra.mxu1 %v1467_v31  ;;  %v1483_v44 = vld [vmem:[%s1849_s9 + $0x38] ss:$12 sps:$4 sm:$0xff]   ;;  %v1487_v48 = vld [vmem:[%s1849_s9 + $0x20] ss:$12 sps:$4 sm:$0xff]   ;;  %v1468_v49 = vld [vmem:[%s1877_s29 + $0x90] ss:$12 sps:$4 sm:$0xff]  }
 0x1b3   : > { %1322 = vmatprep.subr.bf16.mxu1 %v1646_v21  ;;  %v1474_v50 = vld [vmem:[%s1877_s29 + $0x7c] ss:$12 sps:$4 sm:$0xff]   ;;  %v1472_v52 = vld [vmem:[%s1877_s29 + $0x78] ss:$12 sps:$4 sm:$0xff]   ;;  %v1476_v55 = vld [vmem:[%s1877_s29 + $0x60] ss:$12 sps:$4 sm:$0xff]  }
 0x1b4   : > { %706 = vmatpush1.bf16.msra.mxu0 %v1447_v26  ;;  %v1491_v51 = vld [vmem:[%s1849_s9 + $0x8] ss:$12 sps:$4 sm:$0xff]   ;;  %v1478_v53 = vld [vmem:[%s1877_s29 + $0x64] ss:$12 sps:$4 sm:$0xff]   ;;  %v1482_v56 = vld [vmem:[%s1877_s29 + $0x4c] ss:$12 sps:$4 sm:$0xff]  }
 0x1b5   : > { %707 = vmatprep.subr.bf16.mxu0 %v1448_v27  ;;  %v1495_v54 = vld [vmem:[%s1877_s29 + $0xb0] ss:$12 sps:$4 sm:$0xff]   ;;  %v1496_v57 = vld [vmem:[%s1877_s29 + $0x98] ss:$12 sps:$4 sm:$0xff]   ;;  %v1480_v58 = vld [vmem:[%s1877_s29 + $0x48] ss:$12 sps:$4 sm:$0xff]  }
 0x1b6   : > { %1323 = vmatpush3.bf16.msra.mxu1 %v1471_v34  ;;  %v1486_v59 = vld [vmem:[%s1877_s29 + $0x34] ss:$12 sps:$4 sm:$0xff]   ;;  %v1484_v61 = vld [vmem:[%s1877_s29 + $0x30] ss:$12 sps:$4 sm:$0xff]   ;;  %v1488_v0 = vld [vmem:[%s1877_s29 + $0x18] ss:$12 sps:$4 sm:$0xff]  }
 0x1b7   : > { %1324 = vmatprep.subr.bf16.mxu1 %v1646_v21  ;;  %v1497_v60 = vld [vmem:[%s1877_s29 + $0x80] ss:$12 sps:$4 sm:$0xff]   ;;  %v1490_v62 = vld [vmem:[%s1877_s29 + $0x1c] ss:$12 sps:$4 sm:$0xff]   ;;  %v1494_v1 = vld [vmem:[%s1877_s29 + $0x4] ss:$12 sps:$4 sm:$0xff]  }
 0x1b8   : > { %708 = vmatpush1.bf16.msra.mxu0 %v1450_v28  ;;  %v1498_v63 = vld [vmem:[%s1877_s29 + $0x68] ss:$12 sps:$4 sm:$0xff]   ;;  %v1499_v2 = vld [vmem:[%s1877_s29 + $0x50] ss:$12 sps:$4 sm:$0xff]   ;;  %v1492_v3 = vld [vmem:[%s1877_s29] ss:$12 sps:$4 sm:$0xff]  }
 0x1b9   : > { %709 = vmatprep.subr.bf16.mxu0 %v1451_v30  ;;  %v1947_v4 = vld [vmem:[%s1860_s15] sm:$0xff]  ;;  %v1501_v7 = vld [vmem:[%s1877_s29 + $0x20] ss:$12 sps:$4 sm:$0xff]   ;;  %v1502_v8 = vld [vmem:[%s1877_s29 + $0x8] ss:$12 sps:$4 sm:$0xff]   ;;  %v560_v19 = vsub.s32 0, %v559_v18 }
 0x1ba   : > { %1325 = vmatpush3.bf16.msra.mxu1 %v1475_v37  ;;  %v1500_v5 = vld [vmem:[%s1877_s29 + $0x38] ss:$12 sps:$4 sm:$0xff]   ;;  %v782_v6 = vpack.c.bf16 %v1947_v4, %v1947_v4  ;;  %v564_v25 = vsub.s32 1, %v559_v18 }
 0x1bb   : > { %1326 = vmatprep.subr.bf16.mxu1 %v1646_v21  ;;  %v556_v20 = vld [vmem:[%s1870_s22] sm:$0x7] }
 0x1bc   : > { %710 = vmatpush1.bf16.msra.mxu0 %v1453_v32  ;;  %v561_v23 = vrot.slane %v556_v20, %v560_v19  ;;  %v565_v30 = vrot.slane %v556_v20, %v564_v25 }
 0x1bd   : > { %711 = vmatprep.subr.bf16.mxu0 %v1454_v33 }
 0x1be   : > { %1327 = vmatpush3.bf16.msra.mxu1 %v1479_v40 }
 0x1bf   : > { %1328 = vmatprep.subr.bf16.mxu1 %v1646_v21 }
 0x1c0   : > { %712 = vmatpush1.bf16.msra.mxu0 %v1456_v35 }
 0x1c1   : > { %713 = vmatprep.subr.bf16.mxu0 %v1457_v36 }
 0x1c2   : > { %1329 = vmatpush3.bf16.msra.mxu1 %v1483_v44 }
 0x1c3   : > { %1330 = vmatprep.subr.bf16.mxu1 %v1646_v21 }
 0x1c4   : > { %714 = vmatpush1.bf16.msra.mxu0 %v1459_v38 }
 0x1c5   : > { %715 = vmatprep.subr.bf16.mxu0 %v1460_v39 }
 0x1c6   : > { %1331 = vmatpush3.bf16.msra.mxu1 %v1487_v48 }
 0x1c7   : > { %1332 = vmatprep.subr.bf16.mxu1 %v1646_v21 }
 0x1c8   : > { %716 = vmatpush1.bf16.msra.mxu0 %v1462_v41 }
 0x1c9   : > { %960 = vmatprep.subr.bf16.mxu0 %v1466_v43 }
 0x1ca   : > { %1333 = vmatpush3.bf16.msra.mxu1 %v1491_v51 }
 0x1cb   : > { %734 = vmatmul.mubr.bf16.vlgmr.msra.gmra.mxu0 %v522_v45  ;;  %1338 = vmatprep.subr.bf16.mxu1 %v1646_v21 }
 0x1cc   : > { %961 = vmatpush1.bf16.msra.mxu0 %v1464_v46  ;;  %992 = vmatprep.mubr.bf16.mxu0 %v1647_v22  ;;  %v815_v22 = vld [vmem:[%s1875_s13] sm:$0x7] }
 0x1cd   : > { %962 = vmatprep.subr.bf16.mxu0 %v1470_v47  ;;  %1335 = vmatmul.mubr.bf16.vlgmr.msra.gmra.mxu1 %v522_v45  ;;  %v820_v24 = vrot.slane %v815_v22, %v560_v19  ;;  %v824_v28 = vrot.slane %v815_v22, %v564_v25  ;;  %v568_v45 = vsub.s32 2, %v559_v18 }
 0x1ce   : > { %1339 = vmatpush3.bf16.msra.mxu1 %v1495_v54  ;;  %1354 = vmatprep.mubr.msk.bf16.mxu1 %vm1648_vm3, %v1646_v21 }
 0x1cf   : > { %1340 = vmatprep.subr.bf16.mxu1 %v1646_v21  ;;  %v828_v46 = vrot.slane %v815_v22, %v568_v45  ;;  %v569_v48 = vrot.slane %v556_v20, %v568_v45 }
 0x1d0   : > { %963 = vmatpush1.bf16.msra.mxu0 %v1468_v49 }
 0x1d1   : > { %964 = vmatprep.subr.bf16.mxu0 %v1474_v50 }
 0x1d2   : > { %1341 = vmatpush3.bf16.msra.mxu1 %v1496_v57 }
 0x1d3   : > { %1342 = vmatprep.subr.bf16.mxu1 %v1646_v21 }
 0x1d4   : > { %965 = vmatpush1.bf16.msra.mxu0 %v1472_v52 }
 0x1d5   : > { %966 = vmatprep.subr.bf16.mxu0 %v1478_v53 }
 0x1d6   : > { %1343 = vmatpush3.bf16.msra.mxu1 %v1497_v60 }
 0x1d7   : > { %1344 = vmatprep.subr.bf16.mxu1 %v1646_v21 }
 0x1d8   : > { %967 = vmatpush1.bf16.msra.mxu0 %v1476_v55 }
 0x1d9   : > { %968 = vmatprep.subr.bf16.mxu0 %v1482_v56 }
 0x1da   : > { %1345 = vmatpush3.bf16.msra.mxu1 %v1498_v63 }
 0x1db   : > { %1346 = vmatprep.subr.bf16.mxu1 %v1646_v21 }
 0x1dc   : > { %969 = vmatpush1.bf16.msra.mxu0 %v1480_v58 }
 0x1dd   : > { %970 = vmatprep.subr.bf16.mxu0 %v1486_v59 }
 0x1de   : > { %1347 = vmatpush3.bf16.msra.mxu1 %v1499_v2 }
 0x1df   : > { %1348 = vmatprep.subr.bf16.mxu1 %v1646_v21 }
 0x1e0   : > { %971 = vmatpush1.bf16.msra.mxu0 %v1484_v61 }
 0x1e1   : > { %972 = vmatprep.subr.bf16.mxu0 %v1490_v62 }
 0x1e2   : > { %1349 = vmatpush3.bf16.msra.mxu1 %v1500_v5 }
 0x1e3   : > { %1350 = vmatprep.subr.bf16.mxu1 %v1646_v21 }
 0x1e4   : > { %973 = vmatpush1.bf16.msra.mxu0 %v1488_v0 }
 0x1e5   : > { %974 = vmatprep.subr.bf16.mxu0 %v1494_v1 }
 0x1e6   : > { %1351 = vmatpush3.bf16.msra.mxu1 %v1501_v7 }
 0x1e7   : > { %1352 = vmatprep.subr.bf16.mxu1 %v1646_v21 }
 0x1e8   : > { %975 = vmatpush1.bf16.msra.mxu0 %v1492_v3 }
 0x1ea   : > { %1353 = vmatpush3.bf16.msra.mxu1 %v1502_v8 }
 0x1eb   : > { %993 = vmatmul.mubr.bf16.vlgmr.msra.gmra.mxu0 %v782_v6 }
 0x1ed   : > { %1355 = vmatmul.mubr.bf16.vlgmr.msra.gmra.mxu1 %v782_v6 }
 0x28b   : > { %v735_v9 = vpop.f32.mrf.mxu0 }
 0x28c   : > { %v736_v21 = vadd.f32 %v735_v9, %v561_v23 }
 0x28d   : > { %v737_v10 = vpop.f32.mrf.mxu0  ;;  %v776_v13 = vpop.f32.mrf.mxu1 }
 0x28e   : > { %v738_v36 = vadd.f32 %v737_v10, %v565_v30  ;;  %v777_v52 = vadd.f32 %v776_v13, %v569_v48 }
 0x28f   : > { %v739_v11 = vpop.f32.mrf.mxu0  ;;  %v1336_v14 = vpop.f32.mrf.mxu1 }
 0x291   : > { %v740_v12 = vpop.f32.mrf.mxu0  ;;  %v779_v15 = vpop.f32.mrf.mxu1 }
 0x293   : > { %v1337_v16 = vpop.f32.mrf.mxu1 }
 0x2ab   : > { %v994_v26 = vpop.f32.mrf.mxu0 }
 0x2ac   : > { %v995_v27 = vadd.f32 %v994_v26, %v820_v24 }
 0x2ad   : > { %v996_v29 = vpop.f32.mrf.mxu0  ;;  %v1035_v38 = vpop.f32.mrf.mxu1 }
 0x2ae   : > { %v1041_v31 = vadd.f32 %v995_v27, %v736_v21  ;;  %v997_v34 = vadd.f32 %v996_v29, %v824_v28  ;;  %v1036_v50 = vadd.f32 %v1035_v38, %v828_v46 }
 0x2af   : > { %v998_v32 = vpop.f32.mrf.mxu0  ;;  %v1356_v39 = vpop.f32.mrf.mxu1 }
 0x2b0   : > { %v1267_v33 = vmul.f32 -1.442695, %v1041_v31  ;;  %v1048_v37 = vadd.f32 %v997_v34, %v738_v36 }
 0x2b1   : > { %v999_v35 = vpop.f32.mrf.mxu0  ;;  %v1038_v41 = vpop.f32.mrf.mxu1 }
 0x2b2   : > { %1503 = vpow2.f32 %v1267_v33  ;;  %v1268_v40 = vmul.f32 -1.442695, %v1048_v37 }
 0x2b3   : > { %v1357_v42 = vpop.f32.mrf.mxu1 }
 0x2b4   : > { %1505 = vpow2.f32 %v1268_v40 }
 0x2bf   : > { %v1504_v43 = vpop.eup %1503 }
 0x2c0   : > { %v1045_v44 = vadd.f32 1.0, %v1504_v43 }
 0x2c1   : > { %v1506_v47 = vpop.eup %1505 }
 0x2c2   : > { %1507 = vrcp.f32 %v1045_v44  ;;  %v1052_v49 = vadd.f32 1.0, %v1506_v47 }
 0x2c4   : > { %1509 = vrcp.f32 %v1052_v49 }
 0x2cf   : > { %v1508_v51 = vpop.eup %1507 }
 0x2d0   : > { %v1055_v53 = vmul.f32 %v1508_v51, %v1036_v50 }
 0x2d1   : > { %v1510_v55 = vpop.eup %1509 }
 0x2d2   : > { %v1056_v54 = vadd.f32 %v1055_v53, %v777_v52  ;;  %v1058_v56 = vsub.f32 1.0, %v1510_v55  ;;  %v1060_v58 = vmul.f32 %v1510_v55, %v1947_v4 }
 0x2d4   : > { %1511 = vtanh.f32 %v1056_v54 }
 0x2e1   : > { %v1512_v57 = vpop.eup %1511 }
 0x2e2   : > { %v1059_v59 = vmul.f32 %v1512_v57, %v1058_v56 }
 0x2e4   : > { %v1061_v60 = vadd.f32 %v1060_v58, %v1059_v59 }
 0x2e6   : > { %1062 = vst [vmem:[%s1865_s11] sm:$0xff] %v1061_v60  ;;  %1063 = vst [vmem:[#allocation2] sm:$0xff] %v1061_v60 }
 0x2e7 PF: > { %p18_p1 = scmp.ge.s32.totalorder %s1710_s28, 4   ;;  %s1996_s24 = smov %s1625_s25 }
 0x2e8   : > { %s1997_s25 = smov %s1629_s26  ;;  %s1998_s26 = smov %s1720_s8 }
 0x2e9   : > { %s1999_s27 = smov %s1710_s28  ;;  %20 = sbr.rel (!%p18_p1) target bundleno = 4 (0x4), region = 117 }
 0x2ee   :  { %1083 = vsyncpa [#allocation4], 1 }
 0x2ef   :  { %1085 = vsyncpa [#allocation4 + $0x1], 1 }
 0x2f0   :  { %1086 = vsyncpa [#allocation6], 1 }
 0x2f1   :  { %1088 = vsyncpa [#allocation6 + $0x1], 1 }

</bundles_post_ra>
